<compile_context>
chip_gen: v7x
topology: tpu7x:2x2x1
jax: 0.10.0
libtpu: 0.0.40
codegen_flags: <defaults>
</compile_context>

<pallas_src>
import jax
import jax.numpy as jnp
from jax.experimental import pallas as pl
from jax.experimental.pallas import tpu as pltpu


def _round_up(x, m):
    return (x + m - 1) // m * m


def _vmem_capacity_bytes():
    try:
        info = pltpu.get_tpu_info()
        cap = getattr(info, "vmem_capacity_bytes", None)
        if cap:
            return int(cap)
    except Exception:
        pass
    return 64 * 1024 * 1024          # conservative (v7x-sized) fallback


def make_spp_layer(bs, c, h, w, num_levels, pool_type="max_pool",
                   dtype=jnp.float32):
    """Build forward(x) computing SPPLayer.forward for fixed shapes."""
    if num_levels < 1:
        raise ValueError("num_levels must be >= 1")
    if h // (2 ** (num_levels - 1)) < 1:
        raise ValueError(
            f"num_levels={num_levels} too large for h={h}: "
            f"kernel height h // 2**i would be 0")

    is_max = (pool_type == "max_pool")    # PyTorch: anything else -> avg

    # Static per-level geometry (level i: window height kh, output rows oh).
    level_info = []
    row_off = []
    total_rows = 0
    total_feats = 0
    for i in range(num_levels):
        kh = h // (2 ** i)
        oh = h // kh
        level_info.append((kh, oh))
        row_off.append(total_rows)
        total_rows += oh
        total_feats += c * oh * w
    total_rows_pad = _round_up(total_rows, 8)     # full (8,128) writeback tiles

    N = bs * c * w                                # folded lane axis
    in_bytes = jnp.dtype(dtype).itemsize
    out_bytes = in_bytes

    # ---- lane tile selection -------------------------------------------------
    # VMEM per lane column: double-buffered input block + double-buffered output.
    bytes_per_lane = 2 * (h * in_bytes + total_rows_pad * out_bytes)
    vmem_cap = _vmem_capacity_bytes()
    pipeline_budget = min(vmem_cap // 2, 64 * 1024 * 1024)
    max_tn_vmem = max(128, (pipeline_budget // bytes_per_lane) // 128 * 128)

    # Move ~4 MiB of input per grid step to amortize per-step overhead.
    target_step_bytes = 4 * 1024 * 1024
    tn_target = _round_up(pl.cdiv(target_step_bytes, h * in_bytes), 128)

    tn_cap = _round_up(N, 128)            # never exceed the (padded) lane width
    tn = min(tn_cap, tn_target, max_tn_vmem)
    # v7x dual TensorCore: keep >= 2 steps on the parallel axis when possible.
    if tn_cap >= 256:
        tn = min(tn, max(128, (tn_cap // 2) // 128 * 128))
    grid = (pl.cdiv(N, tn),)

    footprint = tn * bytes_per_lane
    vmem_limit = int(min(vmem_cap - 4 * 1024 * 1024,
                         max(32 * 1024 * 1024, footprint + 8 * 1024 * 1024)))

    # ---- kernel --------------------------------------------------------------
    def spp_kernel(x_ref, o_ref):
        f32 = jnp.float32

        def pool_from_input(kh, oh):
            # Pooled (oh, tn) value for one level, straight from the input ref.
            if oh == 1:
                win = x_ref[0:kh, :]
                if is_max:
                    return jnp.max(win, axis=0, keepdims=True)
                return jnp.sum(win.astype(f32), axis=0, keepdims=True) * (1.0 / kh)
            # kh sublane-strided loads combined with (oh, tn) elementwise ops.
            if is_max:
                acc = x_ref[pl.ds(0, oh, stride=kh), :]
                for k in range(1, kh):
                    acc = jnp.maximum(acc, x_ref[pl.ds(k, oh, stride=kh), :])
                return acc
            acc = x_ref[pl.ds(0, oh, stride=kh), :].astype(f32)
            for k in range(1, kh):
                acc = acc + x_ref[pl.ds(k, oh, stride=kh), :].astype(f32)
            return acc * (1.0 / kh)

        def derive_from_finer(src_off, oh):
            # Combine adjacent row pairs of the already-stored finer level.
            a = o_ref[pl.ds(src_off, oh, stride=2), :]
            b = o_ref[pl.ds(src_off + 1, oh, stride=2), :]
            if is_max:
                return jnp.maximum(a, b)
            return (a.astype(f32) + b.astype(f32)) * 0.5   # mean of two means

        # Finest level first: the only level that reads the full input block.
        last = num_levels - 1
        kh_f, oh_f = level_info[last]
        o_ref[row_off[last]:row_off[last] + oh_f, :] = (
            pool_from_input(kh_f, oh_f).astype(o_ref.dtype))

        # Coarser levels: derive from the next-finer stored rows when the
        # geometry nests (power-of-two h); otherwise pool directly (fallback).
        for i in range(num_levels - 2, -1, -1):
            kh_i, oh_i = level_info[i]
            kh_n, oh_n = level_info[i + 1]
            if kh_i == 2 * kh_n and oh_n == 2 * oh_i:
                lvl = derive_from_finer(row_off[i + 1], oh_i)
            else:
                lvl = pool_from_input(kh_i, oh_i)
            o_ref[row_off[i]:row_off[i] + oh_i, :] = lvl.astype(o_ref.dtype)

        # Zero the sublane pad rows so the writeback tile is fully defined.
        if total_rows_pad > total_rows:
            o_ref[total_rows:total_rows_pad, :] = jnp.zeros(
                (total_rows_pad - total_rows, tn), o_ref.dtype)

    spp_call = pl.pallas_call(
        spp_kernel,
        out_shape=jax.ShapeDtypeStruct((total_rows_pad, N), dtype),
        grid=grid,
        in_specs=[pl.BlockSpec((h, tn), lambda j: (0, j))],
        out_specs=pl.BlockSpec((total_rows_pad, tn), lambda j: (0, j)),
        compiler_params=pltpu.CompilerParams(
            dimension_semantics=("parallel",),
            vmem_limit_bytes=vmem_limit,
            allow_input_fusion=[True]),
    )

    @jax.jit
    def forward(x):
        # (bs, c, h, w) -> (h, bs*c*w): reduced axis h on sublanes, kept axes
        # folded onto lanes. allow_input_fusion lets XLA fold this repack into
        # the pallas_call operand instead of a separate HBM round-trip.
        xr = jnp.transpose(x, (2, 0, 1, 3)).reshape(h, N)
        rows = spp_call(xr)                              # (total_rows_pad, N)
        # Unpack back to PyTorch's view(bs, -1) + cat(dim=-1) layout.
        parts = []
        for i, (_, oh_i) in enumerate(level_info):
            off = row_off[i]
            blk = rows[off:off + oh_i].reshape(oh_i, bs, c, w)
            blk = jnp.transpose(blk, (1, 2, 0, 3)).reshape(bs, c * oh_i * w)
            parts.append(blk)
        return jnp.concatenate(parts, axis=-1)           # (bs, total_feats)

    return forward, total_feats


def spp_reference(x, num_levels, pool_type="max_pool"):
    """Pure-JAX reference mirroring the PyTorch forward."""
    bs, c, h, w = x.shape
    outs = []
    for i in range(num_levels):
        kh = h // (2 ** i)
        out_h = h // kh
        xs = x[:, :, :out_h * kh, :].reshape(bs, c, out_h, kh, w)
        if pool_type == "max_pool":
            pooled = jnp.max(xs, axis=3)
        else:
            pooled = jnp.mean(xs, axis=3)
        outs.append(pooled.reshape(bs, -1))
    return jnp.concatenate(outs, axis=-1)


if __name__ == "__main__":
    bs, c, h, w = 2, 4, 16, 16
    num_levels = 3

    key = jax.random.PRNGKey(0)
    x = jax.random.normal(key, (bs, c, h, w), dtype=jnp.float32)

    for pool_type in ("max_pool", "avg_pool"):
        fwd, total = make_spp_layer(bs, c, h, w, num_levels, pool_type)
        out = jax.block_until_ready(fwd(x))
        ref = spp_reference(x, num_levels, pool_type)
        assert out.shape == (bs, total), (out.shape, (bs, total))
        assert jnp.allclose(out, ref, atol=1e-5), f"mismatch vs reference ({pool_type})"

    print("KERNEL_OK")
</pallas_src>

<mosaic_0001>
module attributes {stable_mosaic.version = 11 : i64} {
  func.func @spp_kernel(%arg0: i32, %arg1: memref<16x128xf32, #tpu.memory_space<vmem>>, %arg2: memref<8x128xf32, #tpu.memory_space<vmem>>) attributes {dimension_semantics = [#tpu.dimension_semantics<parallel>], iteration_bounds = array<i64: 1>, scalar_prefetch = 0 : i64, scratch_operands = 0 : i64, tpu.core_type = #tpu.core_type<tc>, window_params = [{transform_indices = @transform_0, window_bounds = array<i64: 16, 128>}, {transform_indices = @transform_1, window_bounds = array<i64: 8, 128>}]} {
    %c0 = arith.constant 0 : index
    %c0_0 = arith.constant 0 : index
    %0 = tpu.strided_load %arg1[%c0, %c0_0] {strides = array<i32: 4, 1>} : memref<16x128xf32, #tpu.memory_space<vmem>>, vector<4x128xf32>
    %c1 = arith.constant 1 : index
    %c0_1 = arith.constant 0 : index
    %1 = tpu.strided_load %arg1[%c1, %c0_1] {strides = array<i32: 4, 1>} : memref<16x128xf32, #tpu.memory_space<vmem>>, vector<4x128xf32>
    %2 = arith.maximumf %0, %1 : vector<4x128xf32>
    %c2 = arith.constant 2 : index
    %c0_2 = arith.constant 0 : index
    %3 = tpu.strided_load %arg1[%c2, %c0_2] {strides = array<i32: 4, 1>} : memref<16x128xf32, #tpu.memory_space<vmem>>, vector<4x128xf32>
    %4 = arith.maximumf %2, %3 : vector<4x128xf32>
    %c3 = arith.constant 3 : index
    %c0_3 = arith.constant 0 : index
    %5 = tpu.strided_load %arg1[%c3, %c0_3] {strides = array<i32: 4, 1>} : memref<16x128xf32, #tpu.memory_space<vmem>>, vector<4x128xf32>
    %6 = arith.maximumf %4, %5 : vector<4x128xf32>
    %c3_4 = arith.constant 3 : index
    %c0_5 = arith.constant 0 : index
    %7 = vector.load %arg2[%c3_4, %c0_5] : memref<8x128xf32, #tpu.memory_space<vmem>>, vector<4x128xf32>
    tpu.vector_store %arg2[%c3_4, %c0_5], %6 {strides = array<i32>} : memref<8x128xf32, #tpu.memory_space<vmem>>, vector<4x128xf32>,
    %c3_6 = arith.constant 3 : index
    %c0_7 = arith.constant 0 : index
    %8 = tpu.strided_load %arg2[%c3_6, %c0_7] {strides = array<i32: 2, 1>} : memref<8x128xf32, #tpu.memory_space<vmem>>, vector<2x128xf32>
    %c4 = arith.constant 4 : index
    %c0_8 = arith.constant 0 : index
    %9 = tpu.strided_load %arg2[%c4, %c0_8] {strides = array<i32: 2, 1>} : memref<8x128xf32, #tpu.memory_space<vmem>>, vector<2x128xf32>
    %10 = arith.maximumf %8, %9 : vector<2x128xf32>
    %c1_9 = arith.constant 1 : index
    %c0_10 = arith.constant 0 : index
    %11 = vector.load %arg2[%c1_9, %c0_10] : memref<8x128xf32, #tpu.memory_space<vmem>>, vector<2x128xf32>
    tpu.vector_store %arg2[%c1_9, %c0_10], %10 {strides = array<i32>} : memref<8x128xf32, #tpu.memory_space<vmem>>, vector<2x128xf32>,
    %c1_11 = arith.constant 1 : index
    %c0_12 = arith.constant 0 : index
    %12 = tpu.strided_load %arg2[%c1_11, %c0_12] {strides = array<i32: 2, 1>} : memref<8x128xf32, #tpu.memory_space<vmem>>, vector<1x128xf32>
    %c2_13 = arith.constant 2 : index
    %c0_14 = arith.constant 0 : index
    %13 = tpu.strided_load %arg2[%c2_13, %c0_14] {strides = array<i32: 2, 1>} : memref<8x128xf32, #tpu.memory_space<vmem>>, vector<1x128xf32>
    %14 = arith.maximumf %12, %13 : vector<1x128xf32>
    %c0_15 = arith.constant 0 : index
    %c0_16 = arith.constant 0 : index
    %15 = vector.load %arg2[%c0_15, %c0_16] : memref<8x128xf32, #tpu.memory_space<vmem>>, vector<1x128xf32>
    tpu.vector_store %arg2[%c0_15, %c0_16], %14 {strides = array<i32>} : memref<8x128xf32, #tpu.memory_space<vmem>>, vector<1x128xf32>,
    %cst = arith.constant 0.000000e+00 : f32
    %16 = vector.broadcast %cst : f32 to vector<1x128xf32>
    %c7 = arith.constant 7 : index
    %c0_17 = arith.constant 0 : index
    %17 = vector.load %arg2[%c7, %c0_17] : memref<8x128xf32, #tpu.memory_space<vmem>>, vector<1x128xf32>
    tpu.vector_store %arg2[%c7, %c0_17], %16 {strides = array<i32>} : memref<8x128xf32, #tpu.memory_space<vmem>>, vector<1x128xf32>,
    return
  }
  func.func @transform_0(%arg0: i32) -> (i32, i32) {
    %c0_i32 = arith.constant 0 : i32
    %c0_i32_0 = arith.constant 0 : i32
    return %c0_i32, %arg0 : i32, i32
  }
  func.func @transform_1(%arg0: i32) -> (i32, i32) {
    %c0_i32 = arith.constant 0 : i32
    %c0_i32_0 = arith.constant 0 : i32
    return %c0_i32, %arg0 : i32, i32
  }
}

</mosaic_0001>

<bundles_post_ra>
// kernel: forward.1
= control target key start
LH: loop header
LB: loop body
LE: loop exit
PB: predicated region body
PF: predicated region fallthrough
CT: control target
= control target key end

     0   :  { %v44_v2 = vmov 0.0   ;;  %s91_s0 = inlined_call_operand.vmem [shape: f32[16,128], index: 0, kind: input, shape index: {}]   ;;  %s92_s1 = inlined_call_operand.vmem [shape: f32[8,128], index: 1, kind: output, shape index: {}]  }
   0x1   :  { %v8_v0 = vld [vmem:[%s91_s0] ss:$4 sm:$0xf]  ;;  %v36_v1 = vld [vmem:[%s91_s0 + $0x1] ss:$4 sm:$0xf] }
   0x2   :  { %31 = vst [vmem:[%s92_s1 + $0x7] sm:$0x1] %v44_v2  ;;  %v11_v3 = vmax.f32 %v8_v0, %v36_v1  ;;  %v37_v4 = vld [vmem:[%s91_s0 + $0x2] ss:$4 sm:$0xf] }
   0x3   :  { %v38_v5 = vld [vmem:[%s91_s0 + $0x3] ss:$4 sm:$0xf] }
   0x4   :  { %v14_v6 = vmax.f32 %v11_v3, %v37_v4 }
   0x6   :  { %v17_v7 = vmax.f32 %v14_v6, %v38_v5 }
   0x8   :  { %18 = vst [vmem:[%s92_s1 + $0x3] sm:$0xf] %v17_v7 }
   0xf   :  { %v39_v8 = vld [vmem:[%s92_s1 + $0x3] ss:$2 sm:$0x3]  ;;  %v40_v9 = vld [vmem:[%s92_s1 + $0x4] ss:$2 sm:$0x3] }
  0x10   :  { %v23_v10 = vmax.f32 %v39_v8, %v40_v9 }
  0x12   :  { %24 = vst [vmem:[%s92_s1 + $0x1] sm:$0x3] %v23_v10 }
  0x19   :  { %v41_v11 = vld [vmem:[%s92_s1 + $0x1] ss:$2 sm:$0x1]  ;;  %v42_v12 = vld [vmem:[%s92_s1 + $0x2] ss:$2 sm:$0x1] }
  0x1a   :  { %v29_v13 = vmax.f32 %v41_v11, %v42_v12 }
  0x1c   :  { %30 = vst [vmem:[%s92_s1] sm:$0x1] %v29_v13 }

</bundles_post_ra>
